<compile_context>
chip_gen: v6e
topology: v6e:2x2x1
jax: 0.10.0
libtpu: 0.0.40
codegen_flags: <defaults>
</compile_context>

<pallas_src>
import functools

import jax
import jax.numpy as jnp
from jax.experimental import pallas as pl
from jax.experimental.pallas import tpu as pltpu


# ----------------------------- fused kernel --------------------------------


def fused_tcn_kernel(x_ref, w_ref, o_ref, *, meta, seq_len):
    """Full TCN forward for ONE batch row (grid axis 0 = batch, 'parallel').

    x_ref: (1, L, 1) input block (channels-last)
    w_ref: (R, Cmax) packed weight slab; `meta` holds static (offset, rows, cols)
    o_ref: (1, 1, out_size)
    """
    f32 = jnp.float32
    L = seq_len

    def ld(ent):
        off, rows, cols = ent
        return w_ref[off:off + rows, 0:cols]          # static, sublane-aligned slice

    h = x_ref[0].astype(f32)                          # (L, 1)

    # Hoisted once; reused by every causal shift (broadcast at the compare).
    t_col = jax.lax.broadcasted_iota(jnp.int32, (L, 1), 0)

    def causal_shift(v, d):
        # v[t - d] with zeros for t < d  (== causal left-pad + chomp).
        if d >= L:
            return jnp.zeros_like(v)
        rolled = pltpu.roll(v, shift=d, axis=0)       # rolled[t] = v[t - d]  (XLU slot)
        return rolled * (t_col >= d).astype(f32)      # lane-broadcast mask (VPU)

    for blk in meta["blocks"]:
        d, cin = blk["d"], blk["cin"]
        x_in = h
        b1 = ld(blk["b1"])

        # conv1 (causal dilated, k=2) + chomp + relu    (dropout = identity)
        if cin == 1:
            # K=1 matmul is an outer product: keep it on the VPU (no MXU push/drain).
            w10 = ld(blk["w10"])
            w11 = ld(blk["w11"])
            h1 = causal_shift(h, d) * w10 + h * w11 + b1
        else:
            # Both taps fused into one MXU matmul: [shift(h), h] @ [w10; w11].
            w1 = ld(blk["w1"])
            k1 = jnp.concatenate([causal_shift(h, d), h], axis=1)
            h1 = jnp.dot(k1, w1, preferred_element_type=f32) + b1
        h1 = jnp.maximum(h1, 0.0)

        # conv2 (causal dilated, k=2) + chomp + relu    (dropout = identity)
        w2 = ld(blk["w2"])
        b2 = ld(blk["b2"])
        k2 = jnp.concatenate([causal_shift(h1, d), h1], axis=1)
        h2 = jnp.maximum(jnp.dot(k2, w2, preferred_element_type=f32) + b2, 0.0)

        # residual branch (1x1 conv iff Cin != Cout) + final relu
        if blk["has_ds"]:
            wd = ld(blk["wd"])
            bd = ld(blk["bd"])
            if cin == 1:
                res = x_in * wd + bd                  # VPU outer product
            else:
                res = jnp.dot(x_in, wd, preferred_element_type=f32) + bd
        else:
            res = x_in
        h = jnp.maximum(h2 + res, 0.0)

    # decoder on the last timestep (== torch y[:, :, -1] @ W_dec^T + b_dec)
    dec_w = ld(meta["dec_w"])
    dec_b = ld(meta["dec_b"])
    y_last = h[L - 1:L, :]                            # single static row slice
    o = jnp.dot(y_last, dec_w, preferred_element_type=f32) + dec_b   # (1, out_size)
    # out_size < 128 -> masked store; negligible here, pad out_size at scale.
    o_ref[...] = o.reshape(o_ref.shape).astype(o_ref.dtype)


# ---------------------------- weight packing --------------------------------


def pack_params(params):
    """Pack every weight/bias into one (rows, c_max) f32 slab + static metadata.

    Each entry starts on an 8-row (sublane-aligned) boundary. Conv taps are
    pre-stacked as [w_tap0; w_tap1] so the kernel does one matmul per conv.
    """
    entries = []          # (row_offset, array)
    row = 0

    def add(arr):
        nonlocal row
        arr = jnp.asarray(arr, jnp.float32)
        off = row
        entries.append((off, arr))
        row += ((arr.shape[0] + 7) // 8) * 8
        return (off, int(arr.shape[0]), int(arr.shape[1]))

    blocks_meta = []
    for p in params["blocks"]:
        cin, cout = int(p["w10"].shape[0]), int(p["w10"].shape[1])
        bm = dict(d=int(p["dilation"]), cin=cin, cout=cout,
                  has_ds=bool(p["has_downsample"]))
        if cin == 1:
            bm["w10"] = add(p["w10"])
            bm["w11"] = add(p["w11"])
        else:
            bm["w1"] = add(jnp.concatenate([p["w10"], p["w11"]], axis=0))
        bm["b1"] = add(p["b1"])
        bm["w2"] = add(jnp.concatenate([p["w20"], p["w21"]], axis=0))
        bm["b2"] = add(p["b2"])
        if bm["has_ds"]:
            bm["wd"] = add(p["wd"])
            bm["bd"] = add(p["bd"])
        blocks_meta.append(bm)

    dec_w = add(params["dec_w_t"])
    dec_b = add(params["dec_b"])

    c_max = max(arr.shape[1] for _, arr in entries)
    slab = jnp.zeros((max(row, 8), c_max), jnp.float32)
    for off, arr in entries:
        slab = slab.at[off:off + arr.shape[0], :arr.shape[1]].set(arr)

    return slab, dict(blocks=blocks_meta, dec_w=dec_w, dec_b=dec_b)


# ------------------------------- wrapper ------------------------------------


def tcn_forward(x, params):
    """x: (B, L) float32 — same tensor torch's TCN.forward receives."""
    B, L = x.shape
    slab, meta = pack_params(params)
    out_size = meta["dec_w"][2]

    # torch: unsqueeze(-1).transpose(1,2) -> (B, 1, L); here channels-last (B, L, 1).
    x3d = x.reshape(B, L, 1).astype(jnp.float32)

    kern = functools.partial(fused_tcn_kernel, meta=meta, seq_len=L)
    out = pl.pallas_call(
        kern,
        out_shape=jax.ShapeDtypeStruct((B, 1, out_size), jnp.float32),
        grid=(B,),
        in_specs=[
            pl.BlockSpec((1, L, 1), lambda b: (b, 0, 0)),
            pl.BlockSpec(slab.shape, lambda b: (0, 0)),   # constant block: DMA'd once
        ],
        out_specs=pl.BlockSpec((1, 1, out_size), lambda b: (b, 0, 0)),
        compiler_params=pltpu.CompilerParams(
            dimension_semantics=("parallel",)),           # megacore sharding on v7x
    )(x3d, slab)
    return out[:, 0, :]


# --------------------------- pure-JAX reference ------------------------------


def tcn_reference(x, params):
    """Straightforward JAX port of the torch forward (explicit causal zero-pad)."""
    B, L = x.shape
    hi = jax.lax.Precision.HIGHEST
    h = x.astype(jnp.float32)[..., None]                  # (B, L, 1) channels-last

    for p in params["blocks"]:
        d = p["dilation"]

        def shift(v, d=d):
            if d >= L:
                return jnp.zeros_like(v)
            pad = jnp.zeros((B, d, v.shape[-1]), v.dtype)
            return jnp.concatenate([pad, v[:, :L - d, :]], axis=1)

        x_in = h
        h1 = jnp.maximum(
            jnp.einsum("blc,co->blo", shift(h), p["w10"], precision=hi)
            + jnp.einsum("blc,co->blo", h, p["w11"], precision=hi) + p["b1"], 0.0)
        h2 = jnp.maximum(
            jnp.einsum("blc,co->blo", shift(h1), p["w20"], precision=hi)
            + jnp.einsum("blc,co->blo", h1, p["w21"], precision=hi) + p["b2"], 0.0)
        if p["has_downsample"]:
            res = jnp.einsum("blc,co->blo", x_in, p["wd"], precision=hi) + p["bd"]
        else:
            res = x_in
        h = jnp.maximum(h2 + res, 0.0)

    y = h[:, -1, :]
    return jnp.dot(y, params["dec_w_t"], precision=hi) + params["dec_b"]


# -------------------------- parameter setup ---------------------------------


def _weight_norm(v, g):
    # PyTorch weight_norm (dim=0): w = g * v / ||v||, norm over all dims but 0.
    norm = jnp.sqrt(jnp.sum(v * v, axis=(1, 2), keepdims=True))
    return g[:, None, None] * v / norm


def init_params(key, input_size, output_size, num_channels, kernel_size=2):
    assert kernel_size == 2, "two-tap formulation assumes kernel_size=2 (module default)"
    blocks = []
    in_c = input_size
    for i, out_c in enumerate(num_channels):
        key, k1, k2, k3, k4, k5, k6, k7, k8 = jax.random.split(key, 9)
        v1 = 0.01 * jax.random.normal(k1, (out_c, in_c, kernel_size), jnp.float32)
        g1 = 1.0 + 0.1 * jax.random.normal(k2, (out_c,), jnp.float32)
        w1 = _weight_norm(v1, g1)                      # (out_c, in_c, k)
        b1 = 0.01 * jax.random.normal(k3, (out_c,), jnp.float32)

        v2 = 0.01 * jax.random.normal(k4, (out_c, out_c, kernel_size), jnp.float32)
        g2 = 1.0 + 0.1 * jax.random.normal(k5, (out_c,), jnp.float32)
        w2 = _weight_norm(v2, g2)
        b2 = 0.01 * jax.random.normal(k6, (out_c,), jnp.float32)

        has_ds = in_c != out_c
        blk = dict(
            dilation=2 ** i,
            has_downsample=has_ds,
            w10=jnp.transpose(w1[:, :, 0]),   # tap 0 -> (in_c, out_c)
            w11=jnp.transpose(w1[:, :, 1]),   # tap 1
            b1=b1[None, :],
            w20=jnp.transpose(w2[:, :, 0]),
            w21=jnp.transpose(w2[:, :, 1]),
            b2=b2[None, :],
        )
        if has_ds:
            blk["wd"] = 0.01 * jax.random.normal(k7, (out_c, in_c), jnp.float32).T
            blk["bd"] = (0.01 * jax.random.normal(k8, (out_c,), jnp.float32))[None, :]
        blocks.append(blk)
        in_c = out_c

    key, kd = jax.random.split(key)
    # TCN.init_weights: decoder.weight ~ U(-0.1, 0.1), decoder.bias = 0
    dec_w = jax.random.uniform(kd, (output_size, num_channels[-1]), jnp.float32, -0.1, 0.1)
    dec_b = jnp.zeros((output_size,), jnp.float32)
    return dict(blocks=blocks, dec_w_t=jnp.transpose(dec_w), dec_b=dec_b[None, :])


# ------------------------------ main ----------------------------------------


if __name__ == "__main__":
    B, L = 2, 16                 # batch, sequence length
    input_size = 1               # forced by forward(): unsqueeze(-1).transpose(1,2)
    output_size = 5
    num_channels = [8, 16]       # two TemporalBlocks, dilations 1 and 2

    key = jax.random.PRNGKey(0)
    key, kx = jax.random.split(key)
    x = jax.random.normal(kx, (B, L), jnp.float32)

    params = init_params(key, input_size, output_size, num_channels, kernel_size=2)

    out = jax.block_until_ready(tcn_forward(x, params))
    assert out.shape == (B, output_size) and out.dtype == jnp.float32

    ref = jax.block_until_ready(tcn_reference(x, params))
    if not jnp.allclose(out, ref, rtol=1e-3, atol=1e-4):
        raise AssertionError(
            "kernel/reference mismatch, max|diff|="
            f"{float(jnp.max(jnp.abs(out - ref)))}")

    print("KERNEL_OK")
</pallas_src>

<mosaic_0001>
module attributes {stable_mosaic.version = 11 : i64} {
  func.func @fused_tcn_kernel(%arg0: i32, %arg1: memref<1x16x1xf32, #tpu.memory_space<vmem>>, %arg2: memref<168x16xf32, #tpu.memory_space<vmem>>, %arg3: memref<1x1x5xf32, #tpu.memory_space<vmem>>) attributes {dimension_semantics = [#tpu.dimension_semantics<parallel>], iteration_bounds = array<i64: 2>, scalar_prefetch = 0 : i64, scratch_operands = 0 : i64, tpu.core_type = #tpu.core_type<tc>, window_params = [{transform_indices = @transform_0, window_bounds = array<i64: 1, 16, 1>}, {pipeline_mode = #tpu.pipeline_mode<synchronous>, transform_indices = @transform_1, window_bounds = array<i64: 168, 16>}, {transform_indices = @transform_2, window_bounds = array<i64: 1, 1, 5>}]} {
    %c0 = arith.constant 0 : index
    %c0_0 = arith.constant 0 : index
    %c0_1 = arith.constant 0 : index
    %0 = vector.load %arg1[%c0, %c0_0, %c0_1] : memref<1x16x1xf32, #tpu.memory_space<vmem>>, vector<1x16x1xf32>
    %1 = vector.shape_cast %0 : vector<1x16x1xf32> to vector<16x1xf32>
    %2 = tpu.iota {dimensions = array<i32: 0>} : vector<16x1xi32>
    %c16 = arith.constant 16 : index
    %c0_2 = arith.constant 0 : index
    %3 = vector.load %arg2[%c16, %c0_2] : memref<168x16xf32, #tpu.memory_space<vmem>>, vector<1x8xf32>
    %c0_3 = arith.constant 0 : index
    %c0_4 = arith.constant 0 : index
    %4 = vector.load %arg2[%c0_3, %c0_4] : memref<168x16xf32, #tpu.memory_space<vmem>>, vector<1x8xf32>
    %c8 = arith.constant 8 : index
    %c0_5 = arith.constant 0 : index
    %5 = vector.load %arg2[%c8, %c0_5] : memref<168x16xf32, #tpu.memory_space<vmem>>, vector<1x8xf32>
    %c1_i32 = arith.constant 1 : i32
    %6 = tpu.dynamic_rotate %1 by %c1_i32 dim 0 : vector<16x1xf32>, i32 -> vector<16x1xf32>
    %c1_i32_6 = arith.constant 1 : i32
    %7 = vector.broadcast %c1_i32_6 : i32 to vector<16x1xi32>
    %8 = arith.cmpi sge, %2, %7 : vector<16x1xi32>
    %9 = arith.extui %8 : vector<16x1xi1> to vector<16x1xi32>
    %10 = arith.sitofp %9 : vector<16x1xi32> to vector<16x1xf32>
    %11 = arith.mulf %6, %10 : vector<16x1xf32>
    %12 = vector.broadcast %11 : vector<16x1xf32> to vector<16x8xf32>
    %13 = vector.broadcast %4 : vector<1x8xf32> to vector<16x8xf32>
    %14 = arith.mulf %12, %13 : vector<16x8xf32>
    %15 = vector.broadcast %1 : vector<16x1xf32> to vector<16x8xf32>
    %16 = vector.broadcast %5 : vector<1x8xf32> to vector<16x8xf32>
    %17 = arith.mulf %15, %16 : vector<16x8xf32>
    %18 = arith.addf %14, %17 : vector<16x8xf32>
    %19 = vector.broadcast %3 : vector<1x8xf32> to vector<16x8xf32>
    %20 = arith.addf %18, %19 : vector<16x8xf32>
    %cst = arith.constant 0.000000e+00 : f32
    %21 = vector.broadcast %cst : f32 to vector<16x8xf32>
    %22 = arith.maximumf %20, %21 : vector<16x8xf32>
    %c24 = arith.constant 24 : index
    %c0_7 = arith.constant 0 : index
    %23 = vector.load %arg2[%c24, %c0_7] : memref<168x16xf32, #tpu.memory_space<vmem>>, vector<16x8xf32>
    %c40 = arith.constant 40 : index
    %c0_8 = arith.constant 0 : index
    %24 = vector.load %arg2[%c40, %c0_8] : memref<168x16xf32, #tpu.memory_space<vmem>>, vector<1x8xf32>
    %c1_i32_9 = arith.constant 1 : i32
    %25 = tpu.dynamic_rotate %22 by %c1_i32_9 dim 0 : vector<16x8xf32>, i32 -> vector<16x8xf32>
    %c1_i32_10 = arith.constant 1 : i32
    %26 = vector.broadcast %c1_i32_10 : i32 to vector<16x1xi32>
    %27 = arith.cmpi sge, %2, %26 : vector<16x1xi32>
    %28 = arith.extui %27 : vector<16x1xi1> to vector<16x1xi32>
    %29 = arith.sitofp %28 : vector<16x1xi32> to vector<16x1xf32>
    %30 = vector.broadcast %29 : vector<16x1xf32> to vector<16x8xf32>
    %31 = arith.mulf %25, %30 : vector<16x8xf32>
    %32 = tpu.concatenate %31, %22 in 1 : vector<16x8xf32>, vector<16x8xf32> -> vector<16x16xf32>
    %cst_11 = arith.constant dense<0.000000e+00> : vector<16x8xf32>
    %33 = tpu.matmul %32, %23, %cst_11 {dimension_numbers = #tpu.dot_dimension_numbers<[1], [0], [0], [1], [0, 0, 1, 1], [], []>} : vector<16x16xf32>, vector<16x8xf32>, vector<16x8xf32> -> vector<16x8xf32>
    %34 = vector.broadcast %24 : vector<1x8xf32> to vector<16x8xf32>
    %35 = arith.addf %33, %34 : vector<16x8xf32>
    %cst_12 = arith.constant 0.000000e+00 : f32
    %36 = vector.broadcast %cst_12 : f32 to vector<16x8xf32>
    %37 = arith.maximumf %35, %36 : vector<16x8xf32>
    %c48 = arith.constant 48 : index
    %c0_13 = arith.constant 0 : index
    %38 = vector.load %arg2[%c48, %c0_13] : memref<168x16xf32, #tpu.memory_space<vmem>>, vector<1x8xf32>
    %c56 = arith.constant 56 : index
    %c0_14 = arith.constant 0 : index
    %39 = vector.load %arg2[%c56, %c0_14] : memref<168x16xf32, #tpu.memory_space<vmem>>, vector<1x8xf32>
    %40 = vector.broadcast %1 : vector<16x1xf32> to vector<16x8xf32>
    %41 = vector.broadcast %38 : vector<1x8xf32> to vector<16x8xf32>
    %42 = arith.mulf %40, %41 : vector<16x8xf32>
    %43 = vector.broadcast %39 : vector<1x8xf32> to vector<16x8xf32>
    %44 = arith.addf %42, %43 : vector<16x8xf32>
    %45 = arith.addf %37, %44 : vector<16x8xf32>
    %cst_15 = arith.constant 0.000000e+00 : f32
    %46 = vector.broadcast %cst_15 : f32 to vector<16x8xf32>
    %47 = arith.maximumf %45, %46 : vector<16x8xf32>
    %c80 = arith.constant 80 : index
    %c0_16 = arith.constant 0 : index
    %48 = vector.load %arg2[%c80, %c0_16] : memref<168x16xf32, #tpu.memory_space<vmem>>, vector<1x16xf32>
    %c64 = arith.constant 64 : index
    %c0_17 = arith.constant 0 : index
    %49 = vector.load %arg2[%c64, %c0_17] : memref<168x16xf32, #tpu.memory_space<vmem>>, vector<16x16xf32>
    %c2_i32 = arith.constant 2 : i32
    %50 = tpu.dynamic_rotate %47 by %c2_i32 dim 0 : vector<16x8xf32>, i32 -> vector<16x8xf32>
    %c2_i32_18 = arith.constant 2 : i32
    %51 = vector.broadcast %c2_i32_18 : i32 to vector<16x1xi32>
    %52 = arith.cmpi sge, %2, %51 : vector<16x1xi32>
    %53 = arith.extui %52 : vector<16x1xi1> to vector<16x1xi32>
    %54 = arith.sitofp %53 : vector<16x1xi32> to vector<16x1xf32>
    %55 = vector.broadcast %54 : vector<16x1xf32> to vector<16x8xf32>
    %56 = arith.mulf %50, %55 : vector<16x8xf32>
    %57 = tpu.concatenate %56, %47 in 1 : vector<16x8xf32>, vector<16x8xf32> -> vector<16x16xf32>
    %cst_19 = arith.constant dense<0.000000e+00> : vector<16x16xf32>
    %58 = tpu.matmul %57, %49, %cst_19 {dimension_numbers = #tpu.dot_dimension_numbers<[1], [0], [0], [1], [0, 0, 1, 1], [], []>} : vector<16x16xf32>, vector<16x16xf32>, vector<16x16xf32> -> vector<16x16xf32>
    %59 = vector.broadcast %48 : vector<1x16xf32> to vector<16x16xf32>
    %60 = arith.addf %58, %59 : vector<16x16xf32>
    %cst_20 = arith.constant 0.000000e+00 : f32
    %61 = vector.broadcast %cst_20 : f32 to vector<16x16xf32>
    %62 = arith.maximumf %60, %61 : vector<16x16xf32>
    %c88 = arith.constant 88 : index
    %c0_21 = arith.constant 0 : index
    %63 = vector.load %arg2[%c88, %c0_21] : memref<168x16xf32, #tpu.memory_space<vmem>>, vector<32x16xf32>
    %c120 = arith.constant 120 : index
    %c0_22 = arith.constant 0 : index
    %64 = vector.load %arg2[%c120, %c0_22] : memref<168x16xf32, #tpu.memory_space<vmem>>, vector<1x16xf32>
    %c2_i32_23 = arith.constant 2 : i32
    %65 = tpu.dynamic_rotate %62 by %c2_i32_23 dim 0 : vector<16x16xf32>, i32 -> vector<16x16xf32>
    %c2_i32_24 = arith.constant 2 : i32
    %66 = vector.broadcast %c2_i32_24 : i32 to vector<16x1xi32>
    %67 = arith.cmpi sge, %2, %66 : vector<16x1xi32>
    %68 = arith.extui %67 : vector<16x1xi1> to vector<16x1xi32>
    %69 = arith.sitofp %68 : vector<16x1xi32> to vector<16x1xf32>
    %70 = vector.broadcast %69 : vector<16x1xf32> to vector<16x16xf32>
    %71 = arith.mulf %65, %70 : vector<16x16xf32>
    %72 = tpu.concatenate %71, %62 in 1 : vector<16x16xf32>, vector<16x16xf32> -> vector<16x32xf32>
    %cst_25 = arith.constant dense<0.000000e+00> : vector<16x16xf32>
    %73 = tpu.matmul %72, %63, %cst_25 {dimension_numbers = #tpu.dot_dimension_numbers<[1], [0], [0], [1], [0, 0, 1, 1], [], []>} : vector<16x32xf32>, vector<32x16xf32>, vector<16x16xf32> -> vector<16x16xf32>
    %74 = vector.broadcast %64 : vector<1x16xf32> to vector<16x16xf32>
    %75 = arith.addf %73, %74 : vector<16x16xf32>
    %cst_26 = arith.constant 0.000000e+00 : f32
    %76 = vector.broadcast %cst_26 : f32 to vector<16x16xf32>
    %77 = arith.maximumf %75, %76 : vector<16x16xf32>
    %c128 = arith.constant 128 : index
    %c0_27 = arith.constant 0 : index
    %78 = vector.load %arg2[%c128, %c0_27] : memref<168x16xf32, #tpu.memory_space<vmem>>, vector<8x16xf32>
    %c136 = arith.constant 136 : index
    %c0_28 = arith.constant 0 : index
    %79 = vector.load %arg2[%c136, %c0_28] : memref<168x16xf32, #tpu.memory_space<vmem>>, vector<1x16xf32>
    %cst_29 = arith.constant dense<0.000000e+00> : vector<16x16xf32>
    %80 = tpu.matmul %47, %78, %cst_29 {dimension_numbers = #tpu.dot_dimension_numbers<[1], [0], [0], [1], [0, 0, 1, 1], [], []>} : vector<16x8xf32>, vector<8x16xf32>, vector<16x16xf32> -> vector<16x16xf32>
    %81 = vector.broadcast %79 : vector<1x16xf32> to vector<16x16xf32>
    %82 = arith.addf %80, %81 : vector<16x16xf32>
    %83 = arith.addf %77, %82 : vector<16x16xf32>
    %cst_30 = arith.constant 0.000000e+00 : f32
    %84 = vector.broadcast %cst_30 : f32 to vector<16x16xf32>
    %85 = arith.maximumf %83, %84 : vector<16x16xf32>
    %c144 = arith.constant 144 : index
    %c0_31 = arith.constant 0 : index
    %86 = vector.load %arg2[%c144, %c0_31] : memref<168x16xf32, #tpu.memory_space<vmem>>, vector<16x5xf32>
    %c160 = arith.constant 160 : index
    %c0_32 = arith.constant 0 : index
    %87 = vector.load %arg2[%c160, %c0_32] : memref<168x16xf32, #tpu.memory_space<vmem>>, vector<1x5xf32>
    %88 = vector.extract_strided_slice %85 {offsets = [15, 0], sizes = [1, 16], strides = [1, 1]} : vector<16x16xf32> to vector<1x16xf32>
    %cst_33 = arith.constant dense<0.000000e+00> : vector<1x5xf32>
    %89 = tpu.matmul %88, %86, %cst_33 {dimension_numbers = #tpu.dot_dimension_numbers<[1], [0], [0], [1], [0, 0, 1, 1], [], []>} : vector<1x16xf32>, vector<16x5xf32>, vector<1x5xf32> -> vector<1x5xf32>
    %90 = arith.addf %89, %87 : vector<1x5xf32>
    %91 = vector.shape_cast %90 : vector<1x5xf32> to vector<1x1x5xf32>
    %c0_34 = arith.constant 0 : index
    %c0_35 = arith.constant 0 : index
    %c0_36 = arith.constant 0 : index
    %92 = vector.load %arg3[%c0_34, %c0_35, %c0_36] : memref<1x1x5xf32, #tpu.memory_space<vmem>>, vector<1x1x5xf32>
    tpu.vector_store %arg3[%c0_34, %c0_35, %c0_36], %91 {strides = array<i32>} : memref<1x1x5xf32, #tpu.memory_space<vmem>>, vector<1x1x5xf32>,
    return
  }
  func.func @transform_0(%arg0: i32) -> (i32, i32, i32) {
    %c0_i32 = arith.constant 0 : i32
    %c0_i32_0 = arith.constant 0 : i32
    %c0_i32_1 = arith.constant 0 : i32
    return %arg0, %c0_i32, %c0_i32_0 : i32, i32, i32
  }
  func.func @transform_1(%arg0: i32) -> (i32, i32) {
    %c0_i32 = arith.constant 0 : i32
    %c0_i32_0 = arith.constant 0 : i32
    %c0_i32_1 = arith.constant 0 : i32
    return %c0_i32, %c0_i32_0 : i32, i32
  }
  func.func @transform_2(%arg0: i32) -> (i32, i32, i32) {
    %c0_i32 = arith.constant 0 : i32
    %c0_i32_0 = arith.constant 0 : i32
    %c0_i32_1 = arith.constant 0 : i32
    return %arg0, %c0_i32, %c0_i32_0 : i32, i32, i32
  }
}

</mosaic_0001>

<bundles_post_ra>
// kernel: tpu_custom_call.1
= control target key start
LH: loop header
LB: loop body
LE: loop exit
PB: predicated region body
PF: predicated region fallthrough
CT: control target
= control target key end

     0   :  { %7 = vsyncpa [#allocation3], 0  ;;  %s1199_s0 = inlined_call_operand.vmem [shape: f32[2,16,1], index: 0, kind: input, shape index: {}]   ;;  %s1200_s1 = inlined_call_operand.vmem [shape: f32[168,16], index: 1, kind: input, shape index: {}]   ;;  %s1201_s2 = inlined_call_operand.hbm [shape: f32[2,1,5], index: 2, kind: output, shape index: {}]  }
   0x1   :  { %9 = vsyncpa [#allocation3 + $0x1], 0  ;;  %s999_s9 = smov 0   ;;  %s1001_s10 = smov 0  }
   0x2   :  { %s1003_s11 = smov 0   ;;  %s1005_s12 = smov 0  }
   0x3 LB: > { %s1020_s13 = sadd.s32 4294967295, %s976_s12   ;;  %s783_s14 = sadd.s32 4294967294, %s976_s12   ;;  %s976_s12 = sphi %s1005_s12, %s1207_s12   ;;  %s972_s11 = sphi %s1003_s11, %s1206_s11   ;;  %s968_s10 = sphi %s1001_s10, %s1205_s10   ;;  %s964_s9 = sphi %s999_s9, %s1204_s9  }
   0x4   : > { %s1024_s15 = sadd.s32 1, %s976_s12   ;;  %s69_s16 = sadd.s32 1, %s972_s11 }
   0x5   : > { %s66_s17 = ssub.s32 %s976_s12, %s1024_s15  ;;  %p79_p0 = scmp.ne.s32.totalorder %s972_s11, %s968_s10 }
   0x6   : > { %p67_p1 = scmp.eq.s32.totalorder %s66_s17, 0  ;;  %p80_p2 = scmp.eq.s32.totalorder %s1020_s13, 1 }
   0x7   : > { %p85_p3 = scmp.ne.s32.totalorder %s968_s10, %s964_s9  ;;  %p86_p4 = scmp.eq.s32.totalorder %s783_s14, 1 }
   0x8   : > { %s1035_s18 = scalar_select %p67_p1, %s972_s11, %s69_s16  }
   0x9   : > { %p1037_p5 = por %p80_p2, %p79_p0  ;;  %p1041_p6 = por %p86_p4, %p85_p3 }
   0xa   : > { %p786_p7 = scmp.ge.s32.totalorder %s976_s12, 1  ;;  %p115_p8 = scmp.lt.s32.totalorder %s976_s12, 3 }
   0xc   : > { %p116_p9 = pnand %p786_p7, %p115_p8 }
   0xd   : > { %p136_p10 = scmp.lt.s32.totalorder (!%p116_p9), %s1020_s13, 1  ;;  %s980_s8 = smov (!%p116_p9), 8  }
   0xe   : > { %119 = sbr.rel (%p116_p9) target bundleno = 1329 (0x531), region = 28  ;;  %s134_s30 = sand.u32 (!%p116_p9), 1, %s968_s10  }
   0xf   : > { %s809_s5 = sshll.u32 (!%p116_p9), %s1020_s13, 4  ;;  %s135_s6 = scalar_lea.vmem (!%p116_p9), [#allocation2], %s134_s30 }
  0x10   : > { %s728_s7 = sshll.u32 (!%p116_p9), %s135_s6, 4  ;;  %s1164_s16 = scalar_lea.hbm (!%p116_p9), %s1201_s2, %s809_s5  ;;  %s729_s7 = int_to_ptr.vmem [resolvable:$true] %s728_s7 }
  0x11   : > { %s716_s17 = scalar_lea.sflag (!%p116_p9), [#allocation3], %s134_s30 }
  0x13   : > { %v143_v0 = vlaneseq  ;;  %v978_v1 = vmov 0   ;;  %s137_s21 = scalar_select %p136_p10, %s1020_s13, 1  ;;  %v979_v7 = vmov 0.0   ;;  %v205_v12 = vld [vmem:[%s1200_s1 + $0x20] sm:$0xff]  ;;  %v204_v15 = vld [vmem:[%s1200_s1 + $0x18] sm:$0xff]  ;;  %vm221_vm2 = vcmask 64512  }
  0x14   : > { %915 = vset.pattern.permute.xlu1 %v978_v1  ;;  %914 = vset.pattern.permute.xlu0 %v978_v1  ;;  %v790_v13 = vld [vmem:[%s1200_s1] ss:$0 sm:$0xff]  ;;  %v791_v17 = vld [vmem:[%s1200_s1 + $0x8] ss:$0 sm:$0xff]  ;;  %v792_v22 = vld [vmem:[%s1200_s1 + $0x10] ss:$0 sm:$0xff] }
  0x15   : > { %v1049_v2 = vshrl.u32 %v143_v0, 7  ;;  %s812_s22 = sshll.u32 %s137_s21, 4  ;;  %833 = vmatprep.subr.mxu0 %v205_v12  ;;  %vm228_vm3 = vcmask 130048   ;;  %v332_v40 = vld [vmem:[%s1200_s1 + $0x48] sm:$0xff]  ;;  %v796_v41 = vld [vmem:[%s1200_s1 + $0x30] ss:$0 sm:$0xff] }
  0x16   : > { %s140_s25 = scalar_lea.vmem %s1199_s0, %s812_s22  ;;  %834 = vmatpush3.msra.mxu0 %v205_v12  ;;  %840 = vmatprep.subr.mxu1 %v332_v40  ;;  %v331_v42 = vld [vmem:[%s1200_s1 + $0x40] sm:$0xff]  ;;  %v793_v43 = vld [vmem:[%s1200_s1 + $0x28] ss:$0 sm:$0xff]  ;;  %v797_v45 = vld [vmem:[%s1200_s1 + $0x38] ss:$0 sm:$0xff]  ;;  %s981_s21 = smov 16  }
  0x17   : > { %vm154_vm0 = vcmp.ge.s32.totalorder %v1049_v2, 1  ;;  %v141_v3 = vld [vmem:[%s140_s25] sm:$0xff]  ;;  %v142_v4 = vld [vmem:[%s140_s25 + $0x8] sm:$0xff]  ;;  %vm151_vm1 = vcmp.lt.s32.totalorder %v1049_v2, 1  ;;  %835 = vmatprep.subr.mxu0 %v204_v15  ;;  %841 = vmatpush3.msra.mxu1 %v332_v40  ;;  %vm335_vm4 = vcmp.lt.s32.totalorder %v1049_v2, 2  ;;  %vm338_vm5 = vcmp.ge.s32.totalorder %v1049_v2, 2 }
  0x18   : > { %v149_v5 = vrot.slane %v141_v3, 7  ;;  %v150_v6 = vrot.slane %v142_v4, 7  ;;  %v789_v8 = vsel %vm154_vm0, 1.0, %v979_v7  ;;  %836 = vmatpush3.msra.mxu0 %v204_v15  ;;  %842 = vmatprep.subr.mxu1 %v331_v42  ;;  %v550_v49 = vld [vmem:[%s1200_s1 + $0x80] sm:$0xff]  ;;  %v798_v63 = vsel %vm338_vm5, 1.0, %v979_v7  ;;  %v636_v2 = vld [vmem:[%s1200_s1 + $0x90] sm:$0xff] }
  0x19   : > { %843 = vmatpush3.msra.mxu1 %v331_v42  ;;  %v799_v12 = vld [vmem:[%s1200_s1 + $0x50] ss:$0 sm:$0xff]  ;;  %vm468_vm6 = vcmask 261120   ;;  %vm982_vm7 = vmmov 0   ;;  %vm713_vm8 = vcmask 32768   ;;  %s983_s13 = smov [#allocation2]  }
  0x1a   : > { %v152_v9 = vsel %vm151_vm1, %v149_v5, %v150_v6  ;;  %v153_v10 = vsel %vm151_vm1, %v150_v6, %v149_v5  ;;  %858 = vmatprep.subr.mxu1 %v550_v49  ;;  %s920_s22 = sshll.u32 %s983_s13, 4  ;;  %s921_s22 = int_to_ptr.vmem [resolvable:$false] %s920_s22 }
  0x1b   : > { %169 = vperm.xlu1 %915, %v152_v9   ;;  %v160_v11 = vmul.f32 %v789_v8, %v153_v10  ;;  %v445_v9 = vld [vmem:[%s1200_s1 + $0x68] sm:$0xff]  ;;  %v444_v10 = vld [vmem:[%s1200_s1 + $0x60] sm:$0xff]  ;;  %s922_s23 = scalar_lea.vmem %s921_s22, 32  ;;  %p923_p0 = scmp.lt.s32.totalorder %s729_s7, %s921_s22 }
  0x1d   : > { %164 = vperm.xlu0 %914, %v160_v11   ;;  %v443_v11 = vld [vmem:[%s1200_s1 + $0x58] sm:$0xff] }
  0x1f   : > { %185 = vperm.xlu1 %915, %v142_v4  }
  0x21   : > { %180 = vperm.xlu0 %914, %v141_v3  }
  0x96   : > { %v170_v14 = vpop.permute.xlu1 %169 }
  0x97   : > { %v177_v18 = vmul.f32 %v790_v13, %v170_v14 }
  0x98   : > { %v165_v16 = vpop.permute.xlu0 %164 }
  0x99   : > { %v176_v23 = vmul.f32 %v790_v13, %v165_v16 }
  0x9a   : > { %v186_v19 = vpop.permute.xlu1 %185 }
  0x9b   : > { %v193_v20 = vmul.f32 %v791_v17, %v186_v19  ;;  %v319_v44 = vmul.f32 %v796_v41, %v186_v19 }
  0x9c   : > { %v181_v21 = vpop.permute.xlu0 %180 }
  0x9d   : > { %v195_v24 = vadd.f32 %v193_v20, %v177_v18  ;;  %v192_v25 = vmul.f32 %v791_v17, %v181_v21  ;;  %v318_v47 = vmul.f32 %v796_v41, %v181_v21  ;;  %v325_v51 = vadd.f32 %v797_v45, %v319_v44 }
  0x9f   : > { %v194_v26 = vadd.f32 %v192_v25, %v176_v23  ;;  %v201_v27 = vadd.f32 %v792_v22, %v195_v24  ;;  %v324_v54 = vadd.f32 %v797_v45, %v318_v47 }
  0xa1   : > { %v203_v28 = vmax.f32 %v201_v27, 0.0  ;;  %v200_v29 = vadd.f32 %v792_v22, %v194_v26 }
  0xa3   : > { %217 = vrot.lane.b32.xlu1 %v203_v28, %s980_s8  ;;  %v202_v30 = vmax.f32 %v200_v29, 0.0  ;;  %v208_v31 = vrot.slane %v203_v28, 7 }
  0xa5   : > { %215 = vrot.lane.b32.xlu0 %v202_v30, %s980_s8  ;;  %v207_v32 = vrot.slane %v202_v30, 7  ;;  %v637_v30 = vld [vmem:[%s1200_s1 + $0x98] sm:$0xff] }
  0xa7   : > { %v209_v33 = vsel %vm151_vm1, %v207_v32, %v208_v31  ;;  %v210_v34 = vsel %vm151_vm1, %v208_v31, %v207_v32  ;;  %v802_v31 = vld [vmem:[%s1200_s1 + $0x78] ss:$0 sm:$0xff]  ;;  %v805_v32 = vld [vmem:[%s1200_s1 + $0x88] ss:$0 sm:$0xff] }
  0xa8   : > { %v211_v36 = vmul.f32 %v789_v8, %v210_v34  ;;  %v446_v8 = vld [vmem:[%s1200_s1 + $0x70] sm:$0xff] }
  0xa9   : > { %847 = vmatprep.subr.mxu0 %v446_v8 }
 0x115   : > { %v218_v35 = vpop.permute.xlu1 %217 }
 0x116   : > { %v223_v39 = vsel %vm221_vm2, %v209_v33, %v218_v35 }
 0x117   : > { %v216_v37 = vpop.permute.xlu0 %215 }
 0x118   : > { %v222_v38 = vsel %vm221_vm2, %v211_v36, %v216_v37 }
 0x119   : > { %837 = vmatprep.mubr.msk.f32.mxu0 %vm228_vm3, %v222_v38 }
 0x11a   : > { %838 = vmatmul.mubr.msk.f32.vlgmr.msra.gmra.mxu0 %vm228_vm3, %v223_v39 }
 0x11b   : > { %848 = vmatpush3.msra.mxu0 %v446_v8 }
 0x11c   : > { %849 = vmatprep.subr.mxu0 %v445_v9 }
 0x11d   : > { %850 = vmatpush3.msra.mxu0 %v445_v9 }
 0x11e   : > { %851 = vmatprep.subr.mxu0 %v444_v10 }
 0x11f   : > { %852 = vmatpush3.msra.mxu0 %v444_v10 }
 0x120   : > { %853 = vmatprep.subr.mxu0 %v443_v11 }
 0x121   : > { %854 = vmatpush3.msra.mxu0 %v443_v11 }
 0x1da   : > { %v839_v46 = vpop.f32.mrf.mxu0 }
 0x1db   : > { %v307_v48 = vadd.f32 %v839_v46, %v793_v43 }
 0x1dc   : > { %v301_v50 = vpop.f32.mrf.mxu0 }
 0x1dd   : > { %v311_v52 = vmax.f32 %v307_v48, 0.0  ;;  %v302_v53 = vadd.f32 %v793_v43, %v301_v50 }
 0x1df   : > { %v327_v55 = vadd.f32 %v325_v51, %v311_v52  ;;  %v310_v56 = vmax.f32 %v302_v53, 0.0 }
 0x1e1   : > { %v329_v57 = vmax.f32 %v327_v55, 0.0  ;;  %v326_v58 = vadd.f32 %v324_v54, %v310_v56 }
 0x1e3   : > { %v328_v59 = vmax.f32 %v326_v58, 0.0  ;;  %350 = vrot.lane.b32.xlu1 %v329_v57, %s980_s8  ;;  %v334_v61 = vrot.slane %v329_v57, 6 }
 0x1e5   : > { %348 = vrot.lane.b32.xlu0 %v328_v59, %s980_s8  ;;  %v333_v60 = vrot.slane %v328_v59, 6 }
 0x1e7   : > { %v337_v62 = vsel %vm335_vm4, %v334_v61, %v333_v60  ;;  %v336_v4 = vsel %vm335_vm4, %v333_v60, %v334_v61 }
 0x1e8   : > { %v344_v1 = vmul.f32 %v798_v63, %v337_v62 }
 0x255   : > { %v351_v0 = vpop.permute.xlu1 %350 }
 0x256   : > { %v355_v6 = vsel %vm221_vm2, %v336_v4, %v351_v0 }
 0x257   : > { %v349_v3 = vpop.permute.xlu0 %348 }
 0x258   : > { %v354_v5 = vsel %vm221_vm2, %v344_v1, %v349_v3 }
 0x259   : > { %844 = vmatprep.mubr.msk.f32.mxu1 %vm228_vm3, %v354_v5 }
 0x25a   : > { %845 = vmatmul.mubr.msk.f32.vlgmr.msra.gmra.mxu1 %vm228_vm3, %v355_v6 }
 0x25b   : > { %860 = vmatprep.mubr.msk.f32.mxu1 %vm221_vm2, %v328_v59  ;;  %859 = vmatpush3.msra.mxu1 %v550_v49 }
 0x25c   : > { %863 = vmatprep.subr.mxu1 %v979_v7 }
 0x25e   : > { %861 = vmatmul.mubr.msk.f32.vlgmr.msra.gmra.mxu1 %vm221_vm2, %v329_v57 }
 0x25f   : > { %864 = vmatpush3.msra.mxu1 %v637_v30  ;;  %867 = vmatprep.mubr.msk.f32.mxu1 %vm982_vm7, %v979_v7 }
 0x260   : > { %865 = vmatprep.subr.mxu1 %v979_v7  ;;  %v638_v7 = vld [vmem:[%s1200_s1 + $0xa0] sm:$0x1] }
 0x261   : > { %866 = vmatpush3.msra.mxu1 %v636_v2 }
 0x31a   : > { %v846_v13 = vpop.f32.mrf.mxu1 }
 0x31b   : > { %v438_v14 = vadd.f32 %v846_v13, %v799_v12 }
 0x31c   : > { %v432_v15 = vpop.f32.mrf.mxu1 }
 0x31d   : > { %v442_v16 = vmax.f32 %v438_v14, 0.0  ;;  %v433_v17 = vadd.f32 %v799_v12, %v432_v15 }
 0x31e   : > { %v862_v18 = vpop.f32.mrf.mxu1 }
 0x31f   : > { %v441_v19 = vmax.f32 %v433_v17, 0.0  ;;  %458 = vrot.lane.b32.xlu1 %v442_v16, %s981_s21  ;;  %v449_v21 = vrot.slane %v442_v16, 6  ;;  %v631_v36 = vadd.f32 %v862_v18, %v805_v32 }
 0x320   : > { %v626_v20 = vpop.f32.mrf.mxu1 }
 0x321   : > { %v448_v22 = vrot.slane %v441_v19, 6  ;;  %456 = vrot.lane.b32.xlu0 %v441_v19, %s981_s21  ;;  %s916_s21 = scalar_lea.vmem %s729_s7, 16 }
 0x322   : > { %p917_p11 = scmp.ne.s32.totalorder %s729_s7, %s916_s21  ;;  %p924_p1 = scmp.lt.s32.totalorder %s922_s23, %s916_s21 }
 0x323   : > { %v450_v23 = vsel %vm335_vm4, %v448_v22, %v449_v21  ;;  %v451_v24 = vsel %vm335_vm4, %v449_v21, %v448_v22 }
 0x324   : > { %v452_v26 = vmul.f32 %v798_v63, %v451_v24  ;;  %p918_p12 = pnand %p917_p11, %p1037_p5  ;;  %p925_p2 = por %p924_p1, %p923_p0 }
 0x326   : > { %p919_p13 = pneg %p918_p12 }
 0x328   : > { %p926_p3 = pnand %p925_p2, %p919_p13 }
 0x391   : > { %v459_v25 = vpop.permute.xlu1 %458 }
 0x392   : > { %v463_v29 = vsel %vm228_vm3, %v450_v23, %v459_v25 }
 0x393   : > { %v457_v27 = vpop.permute.xlu0 %456 }
 0x394   : > { %v462_v28 = vsel %vm228_vm3, %v452_v26, %v457_v27 }
 0x395   : > { %855 = vmatprep.mubr.msk.f32.mxu0 %vm468_vm6, %v462_v28 }
 0x396   : > { %856 = vmatmul.mubr.msk.f32.vlgmr.msra.gmra.mxu0 %vm468_vm6, %v463_v29 }
 0x456   : > { %v857_v33 = vpop.f32.mrf.mxu0 }
 0x457   : > { %v546_v34 = vadd.f32 %v857_v33, %v802_v31 }
 0x458   : > { %v541_v35 = vpop.f32.mrf.mxu0 }
 0x459   : > { %v549_v37 = vmax.f32 %v546_v34, 0.0 }
 0x45b   : > { %v634_v38 = vadd.f32 %v631_v36, %v549_v37 }
 0x45d   : > { %v635_v39 = vmax.f32 %v634_v38, 0.0 }
 0x45f   : > { %v640_v40 = vrot.slane %v635_v39, 7 }
 0x461   : > { %868 = vmatmul.mubr.msk.f32.vlgmr.msra.gmra.mxu1 %vm228_vm3, %v640_v40 }
 0x521   : > { %v709_v41 = vpop.f32.mrf.mxu1 }
 0x522   : > { %v710_v42 = vadd.f32 %v709_v41, %v638_v7 }
 0x523   : > { %v869_v43 = vpop.f32.mrf.mxu1 }
 0x524   : > { %714 = vst.msk [vmem:[%s135_s6] sm:$0x1] %vm713_vm8, %v710_v42 }
 0x525   : > { %929 = shalt.err (!%p926_p3)
}
 0x526   : > { %s930_s24 = scalar_lea.hbm %s1164_s16, 16  ;;  %s934_s27 = scalar_lea.hbm %s1201_s2, 32 }
 0x527   : > { %p931_p4 = scmp.ne.s32.totalorder %s1164_s16, %s930_s24  ;;  %p935_p9 = scmp.lt.s32.totalorder %s1164_s16, %s1201_s2 }
 0x528   : > { %p936_p10 = scmp.lt.s32.totalorder %s934_s27, %s930_s24 }
 0x529   : > { %p932_p7 = pnand %p931_p4, %p1037_p5 }
 0x52a   : > { %p937_p11 = por %p936_p10, %p935_p9 }
 0x52b   : > { %p933_p8 = pneg %p932_p7 }
 0x52d   : > { %p938_p12 = pnand %p937_p11, %p933_p8 }
 0x52f   : > { %941 = shalt.err (!%p938_p12)
}
 0x530   : > { %870 = dma.vmem_to_hbm [thread:$0]  (%p1037_p5), %s729_s7, 16, %s1164_s16, %s716_s17  }
 0x531 PF: > { %p876_p13 = scmp.ge.s32.totalorder %s976_s12, 2  ;;  %s740_s30 = sand.u32 1, %s964_s9  }
 0x532   : > { %s741_s3 = scalar_lea.sflag [#allocation3], %s740_s30 }
 0x533   : > { %p873_p0 = pnand %p876_p13, %p1041_p6 }
 0x535   : > { %p874_p1 = pneg %p873_p0 }
 0x537   : > { %959 = dma.done.wait (%p874_p1), %s741_s3, 16  }
 0x538   : > { %961 = vsyncadd (%p874_p1), %s741_s3, 4294967280  ;;  %p12_p2 = scmp.ge.s32.totalorder %s1024_s15, 4   ;;  %s1204_s9 = smov %s968_s10 }
 0x539   : > { %s1205_s10 = smov %s972_s11  ;;  %s1206_s11 = smov %s1035_s18 }
 0x53a   : > { %s1207_s12 = smov %s1024_s15  ;;  %14 = sbr.rel (!%p12_p2) target bundleno = 3 (0x3), region = 63 }
 0x53f   :  { %745 = vsyncpa [#allocation3], 1 }
 0x540   :  { %747 = vsyncpa [#allocation3 + $0x1], 1 }

</bundles_post_ra>
